<compile_context>
chip_gen: v5e
topology: v5e:2x2
jax: 0.10.0
libtpu: 0.0.40
codegen_flags: <defaults>
</compile_context>

<pallas_src>
import functools

import numpy as np
import jax
import jax.numpy as jnp
from jax.experimental import pallas as pl
from jax.experimental.pallas import tpu as pltpu


# ------------------------------ fused kernel ------------------------------

def _encode_decode_kernel(x_ref, w1_ref, b1_ref, w2_ref, b2_ref, o_ref,
                          patch_ref, *, H, W):
    """Fused conv3x3+bias+ReLU backbone and 1x1 decode head for one image.

    x_ref:     (1, Cin, H*W)   channels-first, spatial flattened on lanes
    w1_ref:    (Cmid, 9*Cin)   3x3 taps, flat index = (kh*3 + kw)*Cin + ci
    b1_ref:    (Cmid, 1)
    w2_ref:    (K, Cmid)
    b2_ref:    (K, 1)
    o_ref:     (1, K, H*W)     per-class logits (lane dense)
    patch_ref: (9*Cin, H*W)    VMEM scratch: im2col patch matrix
    """
    Cin = x_ref.shape[1]
    HW = H * W
    x = x_ref[0]                                            # (Cin, HW) f32

    # w-coordinate of every lane; used to zero taps that would read across a
    # row edge.  (The h-edge taps are handled by the zero fill below.)
    wcol = jax.lax.broadcasted_iota(jnp.int32, (Cin, HW), 1) % W
    x_for_dw = {
        -1: jnp.where(wcol == W - 1, 0.0, x),   # tap reads column w-1
        0: x,
        1: jnp.where(wcol == 0, 0.0, x),        # tap reads column w+1
    }

    # Build the (9*Cin, HW) im2col patch matrix ONCE: each tap (dh, dw) is a
    # static lane shift by off = dh*W + dw realised as an offset store into a
    # zero-initialised scratch (out-of-range rows stay zero).
    patch_ref[...] = jnp.zeros(patch_ref.shape, patch_ref.dtype)
    tap = 0
    for dh in (-1, 0, 1):
        for dw in (-1, 0, 1):
            off = dh * W + dw
            src = x_for_dw[dw]
            r0 = tap * Cin
            if off >= 0:
                patch_ref[r0:r0 + Cin, 0:HW - off] = src[:, off:]
            else:
                patch_ref[r0:r0 + Cin, -off:HW] = src[:, :HW + off]
            tap += 1
    patch = patch_ref[...]                                  # (9*Cin, HW)

    # Backbone: one MXU matmul (contraction K = 9*Cin) + bias + ReLU.
    feat = jnp.dot(w1_ref[...], patch, preferred_element_type=jnp.float32)
    feat = jnp.maximum(feat + b1_ref[...], 0.0)             # (Cmid, HW)

    # Decode head (1x1 conv) -> logits, lane-dense output store.
    logits = jnp.dot(w2_ref[...], feat, preferred_element_type=jnp.float32)
    o_ref[0] = (logits + b2_ref[...]).astype(o_ref.dtype)   # (K, HW)


# ------------------------------ JAX wrapper ------------------------------

def exportable_segmentor2_forward(x_nchw, params):
    """ExportableSegmentor2.forward: encode_decode(x) -> (B, K, H, W) logits."""
    w1, b1, w2, b2 = params
    B, Cin, H, W = x_nchw.shape
    Cmid = w1.shape[0]
    K = w2.shape[0]
    HW = H * W

    # NCHW is already channels-first; flattening (H, W) is a free reshape.
    x_flat = x_nchw.reshape(B, Cin, HW).astype(jnp.float32)
    # (Cout, Cin, 3, 3) -> (Cout, kh, kw, Cin) -> (Cout, 9*Cin): matches the
    # tap-major / channel-minor rows of the in-kernel patch matrix.
    w1_mat = jnp.transpose(w1, (0, 2, 3, 1)).reshape(Cmid, 9 * Cin)
    b1_col = b1.reshape(Cmid, 1).astype(jnp.float32)
    w2_mat = w2.reshape(K, Cmid).astype(jnp.float32)
    b2_col = b2.reshape(K, 1).astype(jnp.float32)

    flops = 2 * B * HW * (9 * Cin * Cmid + Cmid * K)
    bytes_accessed = 4 * (x_flat.size + w1_mat.size + b1_col.size
                          + w2_mat.size + b2_col.size + B * K * HW)

    logits = pl.pallas_call(
        functools.partial(_encode_decode_kernel, H=H, W=W),
        out_shape=jax.ShapeDtypeStruct((B, K, HW), jnp.float32),
        grid=(B,),
        in_specs=[
            pl.BlockSpec((1, Cin, HW), lambda b: (b, 0, 0)),
            pl.BlockSpec((Cmid, 9 * Cin), lambda b: (0, 0)),
            pl.BlockSpec((Cmid, 1), lambda b: (0, 0)),
            pl.BlockSpec((K, Cmid), lambda b: (0, 0)),
            pl.BlockSpec((K, 1), lambda b: (0, 0)),
        ],
        out_specs=pl.BlockSpec((1, K, HW), lambda b: (b, 0, 0)),
        scratch_shapes=[pltpu.VMEM((9 * Cin, HW), jnp.float32)],
        compiler_params=pltpu.CompilerParams(
            dimension_semantics=("parallel",)),
        cost_estimate=pl.CostEstimate(flops=flops, transcendentals=0,
                                      bytes_accessed=bytes_accessed),
    )(x_flat, w1_mat, b1_col, w2_mat, b2_col)
    return logits.reshape(B, K, H, W)


# --------------------------- plain-JAX reference ---------------------------

def ref_encode_decode(x_nchw, params):
    w1, b1, w2, b2 = params
    x = x_nchw.astype(jnp.float32)
    feat = jax.lax.conv_general_dilated(
        x, w1, window_strides=(1, 1), padding=((1, 1), (1, 1)),
        dimension_numbers=("NCHW", "OIHW", "NCHW"),
        precision=jax.lax.Precision.HIGHEST)
    feat = jnp.maximum(feat + b1[None, :, None, None], 0.0)
    logits = jnp.einsum("bchw,kc->bkhw", feat, w2,
                        precision=jax.lax.Precision.HIGHEST)
    return logits + b2[None, :, None, None]


# ---------------------------------- main ----------------------------------

if __name__ == "__main__":
    B, C, H, W = 2, 4, 16, 16
    hidden, num_classes = 32, 8

    key = jax.random.PRNGKey(0)
    kx, k1, k2, k3, k4 = jax.random.split(key, 5)

    # Deterministic synthetic segmentor parameters (PyTorch-style shapes).
    w1 = 0.1 * jax.random.normal(k1, (hidden, C, 3, 3), dtype=jnp.float32)
    b1 = 0.1 * jax.random.normal(k2, (hidden,), dtype=jnp.float32)
    w2 = 0.1 * jax.random.normal(k3, (num_classes, hidden), dtype=jnp.float32)
    b2 = 0.1 * jax.random.normal(k4, (num_classes,), dtype=jnp.float32)
    params = (w1, b1, w2, b2)

    x = jax.random.normal(kx, (B, C, H, W), dtype=jnp.float32)   # NCHW input

    fwd = jax.jit(exportable_segmentor2_forward)
    out = jax.block_until_ready(fwd(x, params))

    ref = jax.block_until_ready(ref_encode_decode(x, params))
    assert out.shape == (B, num_classes, H, W) and out.dtype == jnp.float32
    # Loose-ish tolerance: the MXU may round f32 matmul operands to bf16 at
    # default precision, while the reference runs at Precision.HIGHEST.
    np.testing.assert_allclose(np.asarray(out), np.asarray(ref),
                               rtol=2e-2, atol=2e-2)

    print("KERNEL_OK")
</pallas_src>

<mosaic_0001>
module attributes {stable_mosaic.version = 11 : i64} {
  func.func @_encode_decode_kernel(%arg0: i32, %arg1: memref<1x4x256xf32, #tpu.memory_space<vmem>>, %arg2: memref<32x36xf32, #tpu.memory_space<vmem>>, %arg3: memref<32x1xf32, #tpu.memory_space<vmem>>, %arg4: memref<8x32xf32, #tpu.memory_space<vmem>>, %arg5: memref<8x1xf32, #tpu.memory_space<vmem>>, %arg6: memref<1x8x256xf32, #tpu.memory_space<vmem>>, %arg7: memref<36x256xf32, #tpu.memory_space<vmem>>) attributes {dimension_semantics = [#tpu.dimension_semantics<parallel>], iteration_bounds = array<i64: 2>, scalar_prefetch = 0 : i64, scratch_operands = 1 : i64, tpu.core_type = #tpu.core_type<tc>, window_params = [{transform_indices = @transform_0, window_bounds = array<i64: 1, 4, 256>}, {pipeline_mode = #tpu.pipeline_mode<synchronous>, transform_indices = @transform_1, window_bounds = array<i64: 32, 36>}, {pipeline_mode = #tpu.pipeline_mode<synchronous>, transform_indices = @transform_2, window_bounds = array<i64: 32, 1>}, {pipeline_mode = #tpu.pipeline_mode<synchronous>, transform_indices = @transform_3, window_bounds = array<i64: 8, 32>}, {pipeline_mode = #tpu.pipeline_mode<synchronous>, transform_indices = @transform_4, window_bounds = array<i64: 8, 1>}, {transform_indices = @transform_5, window_bounds = array<i64: 1, 8, 256>}]} {
    %c0 = arith.constant 0 : index
    %c0_0 = arith.constant 0 : index
    %c0_1 = arith.constant 0 : index
    %0 = vector.load %arg1[%c0, %c0_0, %c0_1] : memref<1x4x256xf32, #tpu.memory_space<vmem>>, vector<1x4x256xf32>
    %1 = vector.shape_cast %0 : vector<1x4x256xf32> to vector<4x256xf32>
    %2 = tpu.iota {dimensions = array<i32: 1>} : vector<4x256xi32>
    %c16_i32 = arith.constant 16 : i32
    %c0_i32 = arith.constant 0 : i32
    %3 = arith.cmpi eq, %c16_i32, %c0_i32 : i32
    %c1_i32 = arith.constant 1 : i32
    %4 = arith.select %3, %c1_i32, %c16_i32 : i32
    %5 = vector.broadcast %4 : i32 to vector<4x256xi32>
    %6 = arith.remsi %2, %5 : vector<4x256xi32>
    %c0_i32_2 = arith.constant 0 : i32
    %7 = vector.broadcast %c0_i32_2 : i32 to vector<4x256xi32>
    %8 = arith.cmpi ne, %6, %7 : vector<4x256xi32>
    %c0_i32_3 = arith.constant 0 : i32
    %9 = vector.broadcast %c0_i32_3 : i32 to vector<4x256xi32>
    %10 = arith.cmpi slt, %6, %9 : vector<4x256xi32>
    %c0_i32_4 = arith.constant 0 : i32
    %11 = arith.cmpi slt, %4, %c0_i32_4 : i32
    %12 = vector.broadcast %11 : i1 to vector<4x256xi1>
    %13 = vector.broadcast %12 : vector<4x256xi1> to vector<4x256xi1>
    %14 = arith.xori %10, %13 : vector<4x256xi1>
    %15 = arith.andi %14, %8 : vector<4x256xi1>
    %16 = vector.broadcast %4 : i32 to vector<4x256xi32>
    %17 = arith.addi %6, %16 : vector<4x256xi32>
    %18 = arith.select %15, %17, %6 : vector<4x256xi1>, vector<4x256xi32>
    %c15_i32 = arith.constant 15 : i32
    %19 = vector.broadcast %c15_i32 : i32 to vector<4x256xi32>
    %20 = arith.cmpi eq, %18, %19 : vector<4x256xi32>
    %cst = arith.constant 0.000000e+00 : f32
    %21 = vector.broadcast %cst : f32 to vector<4x256xf32>
    %22 = arith.select %20, %21, %1 : vector<4x256xi1>, vector<4x256xf32>
    %c0_i32_5 = arith.constant 0 : i32
    %23 = vector.broadcast %c0_i32_5 : i32 to vector<4x256xi32>
    %24 = arith.cmpi eq, %18, %23 : vector<4x256xi32>
    %cst_6 = arith.constant 0.000000e+00 : f32
    %25 = vector.broadcast %cst_6 : f32 to vector<4x256xf32>
    %26 = arith.select %24, %25, %1 : vector<4x256xi1>, vector<4x256xf32>
    %cst_7 = arith.constant 0.000000e+00 : f32
    %27 = vector.broadcast %cst_7 : f32 to vector<36x256xf32>
    %c0_8 = arith.constant 0 : index
    %c0_9 = arith.constant 0 : index
    %28 = vector.load %arg7[%c0_8, %c0_9] : memref<36x256xf32, #tpu.memory_space<vmem>>, vector<36x256xf32>
    tpu.vector_store %arg7[%c0_8, %c0_9], %27 {strides = array<i32>} : memref<36x256xf32, #tpu.memory_space<vmem>>, vector<36x256xf32>,
    %29 = vector.extract_strided_slice %22 {offsets = [0, 0], sizes = [4, 239], strides = [1, 1]} : vector<4x256xf32> to vector<4x239xf32>
    %c0_10 = arith.constant 0 : index
    %c17 = arith.constant 17 : index
    %30 = vector.load %arg7[%c0_10, %c17] : memref<36x256xf32, #tpu.memory_space<vmem>>, vector<4x239xf32>
    tpu.vector_store %arg7[%c0_10, %c17], %29 {strides = array<i32>} : memref<36x256xf32, #tpu.memory_space<vmem>>, vector<4x239xf32>,
    %31 = vector.extract_strided_slice %1 {offsets = [0, 0], sizes = [4, 240], strides = [1, 1]} : vector<4x256xf32> to vector<4x240xf32>
    %c4 = arith.constant 4 : index
    %c16 = arith.constant 16 : index
    %32 = vector.load %arg7[%c4, %c16] : memref<36x256xf32, #tpu.memory_space<vmem>>, vector<4x240xf32>
    tpu.vector_store %arg7[%c4, %c16], %31 {strides = array<i32>} : memref<36x256xf32, #tpu.memory_space<vmem>>, vector<4x240xf32>,
    %33 = vector.extract_strided_slice %26 {offsets = [0, 0], sizes = [4, 241], strides = [1, 1]} : vector<4x256xf32> to vector<4x241xf32>
    %c8 = arith.constant 8 : index
    %c15 = arith.constant 15 : index
    %34 = vector.load %arg7[%c8, %c15] : memref<36x256xf32, #tpu.memory_space<vmem>>, vector<4x241xf32>
    tpu.vector_store %arg7[%c8, %c15], %33 {strides = array<i32>} : memref<36x256xf32, #tpu.memory_space<vmem>>, vector<4x241xf32>,
    %35 = vector.extract_strided_slice %22 {offsets = [0, 0], sizes = [4, 255], strides = [1, 1]} : vector<4x256xf32> to vector<4x255xf32>
    %c12 = arith.constant 12 : index
    %c1 = arith.constant 1 : index
    %36 = vector.load %arg7[%c12, %c1] : memref<36x256xf32, #tpu.memory_space<vmem>>, vector<4x255xf32>
    tpu.vector_store %arg7[%c12, %c1], %35 {strides = array<i32>} : memref<36x256xf32, #tpu.memory_space<vmem>>, vector<4x255xf32>,
    %c16_11 = arith.constant 16 : index
    %c0_12 = arith.constant 0 : index
    %37 = vector.load %arg7[%c16_11, %c0_12] : memref<36x256xf32, #tpu.memory_space<vmem>>, vector<4x256xf32>
    tpu.vector_store %arg7[%c16_11, %c0_12], %1 {strides = array<i32>} : memref<36x256xf32, #tpu.memory_space<vmem>>, vector<4x256xf32>,
    %38 = vector.extract_strided_slice %26 {offsets = [0, 1], sizes = [4, 255], strides = [1, 1]} : vector<4x256xf32> to vector<4x255xf32>
    %c20 = arith.constant 20 : index
    %c0_13 = arith.constant 0 : index
    %39 = vector.load %arg7[%c20, %c0_13] : memref<36x256xf32, #tpu.memory_space<vmem>>, vector<4x255xf32>
    tpu.vector_store %arg7[%c20, %c0_13], %38 {strides = array<i32>} : memref<36x256xf32, #tpu.memory_space<vmem>>, vector<4x255xf32>,
    %40 = vector.extract_strided_slice %22 {offsets = [0, 15], sizes = [4, 241], strides = [1, 1]} : vector<4x256xf32> to vector<4x241xf32>
    %c24 = arith.constant 24 : index
    %c0_14 = arith.constant 0 : index
    %41 = vector.load %arg7[%c24, %c0_14] : memref<36x256xf32, #tpu.memory_space<vmem>>, vector<4x241xf32>
    tpu.vector_store %arg7[%c24, %c0_14], %40 {strides = array<i32>} : memref<36x256xf32, #tpu.memory_space<vmem>>, vector<4x241xf32>,
    %42 = vector.extract_strided_slice %1 {offsets = [0, 16], sizes = [4, 240], strides = [1, 1]} : vector<4x256xf32> to vector<4x240xf32>
    %c28 = arith.constant 28 : index
    %c0_15 = arith.constant 0 : index
    %43 = vector.load %arg7[%c28, %c0_15] : memref<36x256xf32, #tpu.memory_space<vmem>>, vector<4x240xf32>
    tpu.vector_store %arg7[%c28, %c0_15], %42 {strides = array<i32>} : memref<36x256xf32, #tpu.memory_space<vmem>>, vector<4x240xf32>,
    %44 = vector.extract_strided_slice %26 {offsets = [0, 17], sizes = [4, 239], strides = [1, 1]} : vector<4x256xf32> to vector<4x239xf32>
    %c32 = arith.constant 32 : index
    %c0_16 = arith.constant 0 : index
    %45 = vector.load %arg7[%c32, %c0_16] : memref<36x256xf32, #tpu.memory_space<vmem>>, vector<4x239xf32>
    tpu.vector_store %arg7[%c32, %c0_16], %44 {strides = array<i32>} : memref<36x256xf32, #tpu.memory_space<vmem>>, vector<4x239xf32>,
    %c0_17 = arith.constant 0 : index
    %c0_18 = arith.constant 0 : index
    %46 = vector.load %arg7[%c0_17, %c0_18] : memref<36x256xf32, #tpu.memory_space<vmem>>, vector<36x256xf32>
    %c0_19 = arith.constant 0 : index
    %c0_20 = arith.constant 0 : index
    %47 = vector.load %arg2[%c0_19, %c0_20] : memref<32x36xf32, #tpu.memory_space<vmem>>, vector<32x36xf32>
    %cst_21 = arith.constant dense<0.000000e+00> : vector<32x256xf32>
    %48 = tpu.matmul %47, %46, %cst_21 {dimension_numbers = #tpu.dot_dimension_numbers<[1], [0], [0], [1], [0, 0, 1, 1], [], []>} : vector<32x36xf32>, vector<36x256xf32>, vector<32x256xf32> -> vector<32x256xf32>
    %c0_22 = arith.constant 0 : index
    %c0_23 = arith.constant 0 : index
    %49 = vector.load %arg3[%c0_22, %c0_23] : memref<32x1xf32, #tpu.memory_space<vmem>>, vector<32x1xf32>
    %50 = vector.broadcast %49 : vector<32x1xf32> to vector<32x256xf32>
    %51 = arith.addf %48, %50 : vector<32x256xf32>
    %cst_24 = arith.constant 0.000000e+00 : f32
    %52 = vector.broadcast %cst_24 : f32 to vector<32x256xf32>
    %53 = arith.maximumf %51, %52 : vector<32x256xf32>
    %c0_25 = arith.constant 0 : index
    %c0_26 = arith.constant 0 : index
    %54 = vector.load %arg4[%c0_25, %c0_26] : memref<8x32xf32, #tpu.memory_space<vmem>>, vector<8x32xf32>
    %cst_27 = arith.constant dense<0.000000e+00> : vector<8x256xf32>
    %55 = tpu.matmul %54, %53, %cst_27 {dimension_numbers = #tpu.dot_dimension_numbers<[1], [0], [0], [1], [0, 0, 1, 1], [], []>} : vector<8x32xf32>, vector<32x256xf32>, vector<8x256xf32> -> vector<8x256xf32>
    %c0_28 = arith.constant 0 : index
    %c0_29 = arith.constant 0 : index
    %56 = vector.load %arg5[%c0_28, %c0_29] : memref<8x1xf32, #tpu.memory_space<vmem>>, vector<8x1xf32>
    %57 = vector.broadcast %56 : vector<8x1xf32> to vector<8x256xf32>
    %58 = arith.addf %55, %57 : vector<8x256xf32>
    %c0_30 = arith.constant 0 : index
    %c0_31 = arith.constant 0 : index
    %c0_32 = arith.constant 0 : index
    %59 = vector.load %arg6[%c0_30, %c0_31, %c0_32] : memref<1x8x256xf32, #tpu.memory_space<vmem>>, vector<1x8x256xf32>
    %60 = vector.shape_cast %59 : vector<1x8x256xf32> to vector<8x256xf32>
    %61 = vector.shape_cast %58 : vector<8x256xf32> to vector<1x8x256xf32>
    tpu.vector_store %arg6[%c0_30, %c0_31, %c0_32], %61 {strides = array<i32>} : memref<1x8x256xf32, #tpu.memory_space<vmem>>, vector<1x8x256xf32>,
    return
  }
  func.func @transform_0(%arg0: i32) -> (i32, i32, i32) {
    %c0_i32 = arith.constant 0 : i32
    %c0_i32_0 = arith.constant 0 : i32
    %c0_i32_1 = arith.constant 0 : i32
    return %arg0, %c0_i32, %c0_i32_0 : i32, i32, i32
  }
  func.func @transform_1(%arg0: i32) -> (i32, i32) {
    %c0_i32 = arith.constant 0 : i32
    %c0_i32_0 = arith.constant 0 : i32
    %c0_i32_1 = arith.constant 0 : i32
    return %c0_i32, %c0_i32_0 : i32, i32
  }
  func.func @transform_2(%arg0: i32) -> (i32, i32) {
    %c0_i32 = arith.constant 0 : i32
    %c0_i32_0 = arith.constant 0 : i32
    %c0_i32_1 = arith.constant 0 : i32
    return %c0_i32, %c0_i32_0 : i32, i32
  }
  func.func @transform_3(%arg0: i32) -> (i32, i32) {
    %c0_i32 = arith.constant 0 : i32
    %c0_i32_0 = arith.constant 0 : i32
    %c0_i32_1 = arith.constant 0 : i32
    return %c0_i32, %c0_i32_0 : i32, i32
  }
  func.func @transform_4(%arg0: i32) -> (i32, i32) {
    %c0_i32 = arith.constant 0 : i32
    %c0_i32_0 = arith.constant 0 : i32
    %c0_i32_1 = arith.constant 0 : i32
    return %c0_i32, %c0_i32_0 : i32, i32
  }
  func.func @transform_5(%arg0: i32) -> (i32, i32, i32) {
    %c0_i32 = arith.constant 0 : i32
    %c0_i32_0 = arith.constant 0 : i32
    %c0_i32_1 = arith.constant 0 : i32
    return %arg0, %c0_i32, %c0_i32_0 : i32, i32, i32
  }
}

</mosaic_0001>

<bundles_post_ra>
// kernel: exportable_segmentor2_forward.1
= control target key start
LH: loop header
LB: loop body
LE: loop exit
PB: predicated region body
PF: predicated region fallthrough
CT: control target
= control target key end

     0   :  { %s729_s18 = smov 0   ;;  %s788_s0 = inlined_call_operand.vmem [shape: f32[2,4,256], index: 0, kind: input, shape index: {}]   ;;  %s789_s1 = inlined_call_operand.vmem [shape: f32[32,36], index: 1, kind: input, shape index: {}]   ;;  %s790_s2 = inlined_call_operand.vmem [shape: f32[32,1], index: 2, kind: input, shape index: {}]   ;;  %s791_s3 = inlined_call_operand.vmem [shape: f32[8,32], index: 3, kind: input, shape index: {}]   ;;  %s792_s4 = inlined_call_operand.vmem [shape: f32[8,1], index: 4, kind: input, shape index: {}]   ;;  %s793_s5 = inlined_call_operand.vmem [shape: f32[2,8,256], index: 5, kind: output, shape index: {}]  }
   0x1 LB: > { %s625_s19 = sadd.s32 4294967295, %s687_s18   ;;  %p629_p0 = scmp.ge.s32.totalorder %s687_s18, 1  ;;  %s687_s18 = sphi %s729_s18, %s15_s18  }
   0x2   : > { %p187_p1 = scmp.lt.s32.totalorder %s687_s18, 3 }
   0x4   : > { %p188_p2 = pnand %p629_p0, %p187_p1 }
   0x5   : > { %p215_p3 = scmp.lt.s32.totalorder (!%p188_p2), %s625_s19, 1  ;;  %s689_s24 = smov (!%p188_p2), 113  }
   0x6   : > { %191 = sbr.rel (%p188_p2) target bundleno = 483 (0x1e3), region = 40  ;;  %s690_s25 = smov (!%p188_p2), 1  }
   0x7   : > { %s691_s26 = smov (!%p188_p2), 111   ;;  %s692_s27 = smov (!%p188_p2), 15  }
   0x8   : > { %s693_s28 = smov (!%p188_p2), 127   ;;  %s694_s29 = smov (!%p188_p2), 112  }
   0x9   : > { %s695_s30 = smov (!%p188_p2), 17   ;;  %s696_s6 = smov (!%p188_p2), 16  }
   0xb   : > { %v226_v0 = vlaneseq  ;;  %s795_s19 = smov (!%p215_p3, %s625_s19), 1  ;;  %v697_v24 = vmov 0.0   ;;  %vm320_vm4 = vcmask 1043576   ;;  %vm360_vm5 = vcmask 924672   ;;  %v410_v46 = vld [vmem:[%s790_s2 + $0x18] sm:$0xff]  ;;  %v407_v52 = vld [vmem:[%s790_s2] sm:$0xff] }
   0xc   : > { %s648_s20 = sshll.u32 %s795_s19, 3  ;;  %274 = vst [vmem:[#allocation2 + $0x10] sm:$0xff] %v697_v24  ;;  %vm365_vm6 = vcmask 920576   ;;  %vm375_vm7 = vcmask 916480   ;;  %vm380_vm8 = vcmask 916484   ;;  %vm386_vm9 = vcmask 908288  }
   0xd   : > { %v227_v1 = vand.u32 127, %v226_v0  ;;  %s219_s23 = scalar_lea.vmem %s788_s0, %s648_s20  ;;  %272 = vst [vmem:[#allocation2] sm:$0xff] %v697_v24  ;;  %vm329_vm10 = vcmask 7168   ;;  %vm391_vm11 = vcmask 904192   ;;  %vm333_vm12 = vcmask 1047564   ;;  %v408_v58 = vld [vmem:[%s790_s2 + $0x8] sm:$0xff] }
   0xe   : > { %v225_v3 = vld [vmem:[%s219_s23] sm:$0xff]  ;;  %273 = vst [vmem:[#allocation2 + $0x8] sm:$0xff] %v697_v24  ;;  %vm307_vm13 = vcmask 1047684   ;;  %vm316_vm14 = vcmask 121856   ;;  %vm354_vm15 = vcmask 1039364   ;;  %v698_v47 = vmov 0  }
   0xf   : > { %v228_v2 = vadd.s32 128, %v227_v1  ;;  %256 = vst [vmem:[#allocation1] ss:$2 sm:$0xff] %v225_v3  ;;  %v233_v4 = vand.u32 15, %v227_v1  ;;  %678 = vset.pattern.permute.xlu1 %v698_v47  ;;  %680 = vset.pattern.permute.xlu0 %v698_v47  ;;  %v409_v59 = vld [vmem:[%s790_s2 + $0x10] sm:$0xff]  ;;  %v403_v60 = vld [vmem:[%s789_s1] sm:$0xff] }
  0x10   : > { %275 = vst [vmem:[#allocation2 + $0x18] sm:$0xff] %v697_v24  ;;  %679 = vset.pattern.permute.xlu2 %v698_v47  ;;  %v406_v61 = vld [vmem:[%s789_s1 + $0x18] sm:$0xff]  ;;  %v518_v1 = vld [vmem:[%s792_s4] sm:$0xff] }
  0x11   : > { %v240_v5 = vand.u32 15, %v228_v2  ;;  %vm253_vm0 = vcmp.eq.s32.totalorder %v233_v4, 15  ;;  %vm263_vm2 = vcmp.eq.s32.totalorder %v233_v4, 0  ;;  %276 = vst [vmem:[#allocation2 + $0x20] sm:$0xff] %v697_v24  ;;  %v404_v2 = vld [vmem:[%s789_s1 + $0x8] sm:$0xff]  ;;  %v405_v4 = vld [vmem:[%s789_s1 + $0x10] sm:$0xff] }
  0x12   : > { %277 = vst [vmem:[#allocation2 + $0x28] sm:$0xff] %v697_v24 }
  0x13   : > { %vm254_vm1 = vcmp.eq.s32.totalorder %v240_v5, 15  ;;  %vm264_vm3 = vcmp.eq.s32.totalorder %v240_v5, 0  ;;  %278 = vst [vmem:[#allocation2 + $0x30] sm:$0xff] %v697_v24 }
  0x14   : > { %279 = vst [vmem:[#allocation2 + $0x38] sm:$0xff] %v697_v24 }
  0x15   : > { %280 = vst [vmem:[#allocation2 + $0x40] sm:$0xf] %v697_v24 }
  0x16   : > { %v257_v6 = vld.sshfl [vmem:[#allocation1] sm:$0xff pattern:$0x75316420]  ;;  %v258_v7 = vld.sshfl [vmem:[#allocation1 + $0x8] sm:$0xff pattern:$0x75316420] }
  0x17   : > { %v261_v8 = vsel %vm253_vm0, 0.0, %v257_v6  ;;  %265 = vst [vmem:[#allocation1] ss:$2 sm:$0xff] %v225_v3  ;;  %v262_v9 = vsel %vm254_vm1, 0.0, %v258_v7  ;;  %vm444_vm0 = vcmask 1043456   ;;  %vm349_vm1 = vcmask 1039360  }
  0x18   : > { %356 = vrot.lane.b32.xlu1 %v261_v8, %s689_s24  ;;  %v324_v10 = vrot.slane %v262_v9, 4  ;;  %v323_v14 = vrot.slane %v261_v8, 4  ;;  %281 = vst [vmem:[#allocation2 + $0x48] sm:$0xf] %v697_v24 }
  0x1a   : > { %327 = vrot.lane.b32.xlu2 %v324_v10, %s690_s25 }
  0x1e   : > { %v266_v11 = vld.sshfl [vmem:[#allocation1] sm:$0xff pattern:$0x75316420]  ;;  %v267_v12 = vld.sshfl [vmem:[#allocation1 + $0x8] sm:$0xff pattern:$0x75316420] }
  0x1f   : > { %v270_v13 = vsel %vm263_vm2, 0.0, %v266_v11  ;;  %296 = vst [vmem:[#allocation1 + $0x1] ss:$2 sm:$0xff] %v225_v3  ;;  %v271_v15 = vsel %vm264_vm3, 0.0, %v267_v12  ;;  %vm292_vm2 = vcmask 1043592   ;;  %vm288_vm3 = vcmask 138240  }
  0x20   : > { %382 = vrot.lane.b32.xlu0 %v270_v13, %s691_s26  ;;  %358 = vrot.lane.b32.xlu1 %v262_v9, %s689_s24  ;;  %v344_v18 = vrot.slane %v271_v15, 4  ;;  %v343_v21 = vrot.slane %v270_v13, 4 }
  0x22   : > { %312 = vrot.lane.b32.xlu2 %v270_v13, %s692_s27 }
  0x26   : > { %v297_v16 = vld.sshfl [vmem:[#allocation1] sm:$0xff pattern:$0x75316420]  ;;  %v298_v17 = vld.sshfl [vmem:[#allocation1 + $0x8] sm:$0xff pattern:$0x75316420] }
  0x27   : > { %336 = vst [vmem:[#allocation1] ss:$2 sm:$0xff] %v225_v3 }
  0x28   : > { %384 = vrot.lane.b32.xlu0 %v271_v15, %s691_s26  ;;  %325 = vrot.lane.b32.xlu1 %v323_v14, %s690_s25 }
  0x2e   : > { %v337_v19 = vld.sshfl [vmem:[#allocation1] sm:$0xff pattern:$0x75316420]  ;;  %v338_v20 = vld.sshfl [vmem:[#allocation1 + $0x8] sm:$0xff pattern:$0x75316420] }
  0x2f   : > { %368 = vst [vmem:[#allocation1 + $0x1] ss:$2 sm:$0xff] %v225_v3 }
  0x30   : > { %314 = vrot.lane.b32.xlu0 %v271_v15, %s692_s27  ;;  %347 = vrot.lane.b32.xlu1 %v344_v18, %s693_s28  ;;  %341 = vst [vmem:[#allocation2 + $0x20] sm:$0xf] %v337_v19 }
  0x31   : > { %342 = vst [vmem:[#allocation2 + $0x28] sm:$0xf] %v338_v20 }
  0x36   : > { %v369_v22 = vld.sshfl [vmem:[#allocation1] sm:$0xff pattern:$0x75316420]  ;;  %v370_v23 = vld.sshfl [vmem:[#allocation1 + $0x8] sm:$0xff pattern:$0x75316420] }
  0x37   : > { %371 = vrot.lane.b32.xlu2 %v369_v22, %s694_s29 }
  0x38   : > { %345 = vrot.lane.b32.xlu0 %v343_v21, %s693_s28  ;;  %286 = vrot.lane.b32.xlu1 %v262_v9, %s695_s30 }
  0x3f   : > { %373 = vrot.lane.b32.xlu2 %v370_v23, %s694_s29  ;;  %s649_s29 = sshll.u32 %s795_s19, 4 }
  0x40   : > { %284 = vrot.lane.b32.xlu0 %v261_v8, %s695_s30  ;;  %428 = vperm.xlu1 %678, %v410_v46   ;;  %s224_s7 = scalar_lea.vmem %s793_s5, %s649_s29 }
  0x47   : > { %299 = vrot.lane.b32.xlu2 %v297_v16, %s696_s6 }
  0x48   : > { %301 = vrot.lane.b32.xlu0 %v298_v17, %s696_s6  ;;  %413 = vperm.xlu1 %678, %v407_v52  }
  0x4f   : > { %423 = vperm.xlu2 %679, %v409_v59  }
  0x50   : > { %418 = vperm.xlu0 %680, %v408_v58  }
  0x57   : > { %521 = vperm.xlu2 %679, %v518_v1  }
  0x74   : > { %v328_v25 = vpop.permute.xlu2 %327 }
  0x7c   : > { %v313_v26 = vpop.permute.xlu2 %312 }
  0x7d   : > { %321 = vst.msk [vmem:[#allocation2 + $0x10] sm:$0xf] %vm320_vm4, %v313_v26  ;;  %vm303_vm4 = vcmask 130048  }
  0x8a   : > { %v357_v27 = vpop.permute.xlu1 %356 }
  0x91   : > { %v372_v28 = vpop.permute.xlu2 %371 }
  0x92   : > { %v383_v29 = vpop.permute.xlu0 %382  ;;  %v359_v30 = vpop.permute.xlu1 %358 }
  0x93   : > { %v361_v31 = vsel %vm360_vm5, %v357_v27, %v359_v30  ;;  %366 = vst.msk [vmem:[#allocation2 + $0x38] sm:$0xf] %vm365_vm6, %v359_v30  ;;  %vm431_vm5 = vcmask 293888   ;;  %vm524_vm6 = vcmask 261120  }
  0x94   : > { %364 = vst [vmem:[#allocation2 + $0x30] sm:$0xf] %v361_v31 }
  0x99   : > { %v374_v32 = vpop.permute.xlu2 %373 }
  0x9a   : > { %v376_v33 = vsel %vm375_vm7, %v372_v28, %v374_v32  ;;  %381 = vst.msk [vmem:[#allocation2 + $0x38] sm:$0xf0] %vm380_vm8, %v374_v32  ;;  %v385_v34 = vpop.permute.xlu0 %384  ;;  %v326_v35 = vpop.permute.xlu1 %325 }
  0x9b   : > { %379 = vst [vmem:[#allocation2 + $0x30] sm:$0xf0] %v376_v33  ;;  %v387_v36 = vsel %vm386_vm9, %v383_v29, %v385_v34  ;;  %v330_v37 = vsel %vm329_vm10, %v326_v35, %v328_v25 }
  0x9c   : > { %390 = vst [vmem:[#allocation2 + $0x40] sm:$0xf] %v387_v36 }
  0x9d   : > { %392 = vst.msk [vmem:[#allocation2 + $0x48] sm:$0xf] %vm391_vm11, %v385_v34 }
  0x9e   : > { %334 = vst.msk [vmem:[#allocation2 + $0x10] sm:$0xf0] %vm333_vm12, %v326_v35 }
  0x9f   : > { %335 = vst [vmem:[#allocation2 + $0x18] sm:$0xf0] %v330_v37 }
  0xa1   : > { %v300_v38 = vpop.permute.xlu2 %299  ;;  %v400_v44 = vld [vmem:[#allocation2 + $0x38] sm:$0xff] }
  0xa2   : > { %v315_v39 = vpop.permute.xlu0 %314  ;;  %v348_v40 = vpop.permute.xlu1 %347  ;;  %308 = vst.msk [vmem:[#allocation2] sm:$0xf0] %vm307_vm13, %v300_v38  ;;  %v399_v45 = vld [vmem:[#allocation2 + $0x30] sm:$0xff] }
  0xa3   : > { %v317_v41 = vsel %vm316_vm14, %v313_v26, %v315_v39  ;;  %355 = vst.msk [vmem:[#allocation2 + $0x28] sm:$0xf0] %vm354_vm15, %v348_v40  ;;  %v401_v42 = vld [vmem:[#allocation2 + $0x40] sm:$0xf]  ;;  %v517_v26 = vld [vmem:[%s791_s3] sm:$0xff] }
  0xa4   : > { %322 = vst [vmem:[#allocation2 + $0x18] sm:$0xf] %v317_v41  ;;  %v402_v43 = vld [vmem:[#allocation2 + $0x48] sm:$0xf]  ;;  %634 = vmatpush.msk.msra.mxu0 %vm444_vm0, %v401_v42  ;;  %650 = vmatpush.msk.msra.mxu2 %vm444_vm0, %v401_v42 }
  0xa5   : > { %639 = vmatpush.msk.msra.mxu1 %vm444_vm0, %v402_v43  ;;  %655 = vmatpush.msk.msra.mxu3 %vm444_vm0, %v402_v43  ;;  %v395_v57 = vld [vmem:[#allocation2 + $0x10] sm:$0xff] }
  0xa6   : > { %463 = vmatpush.msra.mxu0 %v399_v45  ;;  %651 = vmatpush.msra.mxu2 %v399_v45 }
  0xa7   : > { %492 = vmatpush.msra.mxu1 %v400_v44  ;;  %656 = vmatpush.msra.mxu3 %v400_v44 }
  0xa9   : > { %v424_v13 = vpop.permute.xlu2 %423 }
  0xaa   : > { %v346_v48 = vpop.permute.xlu0 %345  ;;  %v398_v49 = vld [vmem:[#allocation2 + $0x28] sm:$0xff]  ;;  %v287_v53 = vpop.permute.xlu1 %286 }
  0xab   : > { %v350_v50 = vsel %vm349_vm1, %v346_v48, %v348_v40  ;;  %493 = vmatpush.msra.mxu1 %v398_v49  ;;  %657 = vmatpush.msra.mxu3 %v398_v49  ;;  %v396_v51 = vld [vmem:[#allocation2 + $0x18] sm:$0xff] }
  0xac   : > { %353 = vst [vmem:[#allocation2 + $0x20] sm:$0xf0] %v350_v50 }
  0xad   : > { %494 = vmatpush.msra.mxu1 %v396_v51  ;;  %658 = vmatpush.msra.mxu3 %v396_v51 }
  0xb1   : > { %v522_v34 = vpop.permute.xlu2 %521 }
  0xb2   : > { %v285_v54 = vpop.permute.xlu0 %284  ;;  %v429_v6 = vpop.permute.xlu1 %428 }
  0xb3   : > { %293 = vst.msk [vmem:[#allocation2] sm:$0xf] %vm292_vm2, %v285_v54  ;;  %v289_v55 = vsel %vm288_vm3, %v285_v54, %v287_v53  ;;  %v397_v56 = vld [vmem:[#allocation2 + $0x20] sm:$0xff] }
  0xb4   : > { %294 = vst [vmem:[#allocation2 + $0x8] sm:$0xf] %v289_v55  ;;  %464 = vmatpush.msra.mxu0 %v397_v56  ;;  %652 = vmatpush.msra.mxu2 %v397_v56 }
  0xb6   : > { %465 = vmatpush.msra.mxu0 %v395_v57  ;;  %653 = vmatpush.msra.mxu2 %v395_v57 }
  0xba   : > { %v302_v62 = vpop.permute.xlu0 %301  ;;  %v393_v63 = vld [vmem:[#allocation2] sm:$0xff]  ;;  %v414_v14 = vpop.permute.xlu1 %413 }
  0xbb   : > { %v304_v0 = vsel %vm303_vm4, %v300_v38, %v302_v62  ;;  %466 = vmatpush.msra.mxu0 %v393_v63  ;;  %654 = vmatpush.msra.mxu2 %v393_v63 }
  0xbc   : > { %309 = vst [vmem:[#allocation2 + $0x8] sm:$0xf0] %v304_v0  ;;  %635 = vmatmul.msk.f32.vlgmr.msra.gmra.mxu0 %vm431_vm5, %v403_v60  ;;  %638 = vmatmul.msk.f32.vlgmr.msra.gmra.mxu2 %vm431_vm5, %v406_v61 }
  0xc2   : > { %v419_v12 = vpop.permute.xlu0 %418 }
  0xc3   : > { %v394_v3 = vld [vmem:[#allocation2 + $0x8] sm:$0xff] }
  0xc4   : > { %636 = vmatmul.msk.f32.gmra.mxu0 %vm431_vm5, %v404_v2  ;;  %495 = vmatpush.msra.mxu1 %v394_v3 }
  0xc5   : > { %659 = vmatpush.msra.mxu3 %v394_v3  ;;  %640 = vmatmul.msk.f32.vlgmr.msra.gmra.mxu1 %vm431_vm5, %v403_v60 }
  0xc6   : > { %643 = vmatmul.msk.f32.vlgmr.msra.gmra.mxu3 %vm431_vm5, %v406_v61 }
  0xcc   : > { %637 = vmatmul.msk.f32.gmra.mxu0 %vm431_vm5, %v405_v4 }
  0xcd   : > { %641 = vmatmul.msk.f32.gmra.mxu1 %vm431_vm5, %v404_v2 }
  0xd5   : > { %642 = vmatmul.msk.f32.gmra.mxu1 %vm431_vm5, %v405_v4 }
 0x139   : > { %v468_v5 = vpop.f32.mrf.mxu0 }
 0x13a   : > { %v469_v21 = vadd.f32 %v468_v5, %v414_v14 }
 0x13c   : > { %v509_v25 = vmax.f32 %v469_v21, 0.0 }
 0x13f   : > { %v477_v7 = vpop.f32.mrf.mxu2 }
 0x140   : > { %v478_v8 = vadd.f32 %v477_v7, %v429_v6 }
 0x141   : > { %v471_v9 = vpop.f32.mrf.mxu0 }
 0x142   : > { %v497_v10 = vpop.f32.mrf.mxu1  ;;  %v515_v11 = vmax.f32 %v478_v8, 0.0  ;;  %v472_v15 = vadd.f32 %v471_v9, %v419_v12 }
 0x143   : > { %v498_v30 = vadd.f32 %v497_v10, %v414_v14 }
 0x144   : > { %540 = vmatpush.msrb.mxu2 %v515_v11  ;;  %v511_v23 = vmax.f32 %v472_v15, 0.0 }
 0x145   : > { %v510_v33 = vmax.f32 %v498_v30, 0.0 }
 0x149   : > { %v474_v16 = vpop.f32.mrf.mxu0  ;;  %v506_v17 = vpop.f32.mrf.mxu3 }
 0x14a   : > { %v475_v18 = vadd.f32 %v474_v16, %v424_v13  ;;  %v500_v19 = vpop.f32.mrf.mxu1  ;;  %v507_v20 = vadd.f32 %v506_v17, %v429_v6 }
 0x14b   : > { %v501_v28 = vadd.f32 %v500_v19, %v419_v12 }
 0x14c   : > { %v513_v22 = vmax.f32 %v475_v18, 0.0  ;;  %v516_v24 = vmax.f32 %v507_v20, 0.0 }
 0x14d   : > { %v512_v32 = vmax.f32 %v501_v28, 0.0 }
 0x14e   : > { %541 = vmatpush.msrb.mxu2 %v513_v22  ;;  %560 = vmatpush.msrb.mxu3 %v516_v24 }
 0x150   : > { %542 = vmatpush.msrb.mxu2 %v511_v23 }
 0x152   : > { %v503_v27 = vpop.f32.mrf.mxu1  ;;  %543 = vmatpush.msrb.mxu2 %v509_v25 }
 0x153   : > { %v504_v29 = vadd.f32 %v503_v27, %v424_v13  ;;  %644 = vmatmul.msk.f32.vlgmr.msrb.gmra.mxu2 %vm524_vm6, %v517_v26 }
 0x155   : > { %v514_v31 = vmax.f32 %v504_v29, 0.0 }
 0x157   : > { %561 = vmatpush.msrb.mxu3 %v514_v31 }
 0x159   : > { %562 = vmatpush.msrb.mxu3 %v512_v32 }
 0x15b   : > { %563 = vmatpush.msrb.mxu3 %v510_v33 }
 0x15c   : > { %645 = vmatmul.msk.f32.vlgmr.msrb.gmra.mxu3 %vm524_vm6, %v517_v26 }
 0x1d6   : > { %v545_v35 = vpop.f32.mrf.mxu2 }
 0x1d7   : > { %v546_v36 = vadd.f32 %v545_v35, %v522_v34 }
 0x1d9   : > { %568 = vst [vmem:[%s224_s7] sm:$0xff] %v546_v36 }
 0x1df   : > { %v565_v37 = vpop.f32.mrf.mxu3 }
 0x1e0   : > { %v566_v38 = vadd.f32 %v565_v37, %v522_v34 }
 0x1e2   : > { %569 = vst [vmem:[%s224_s7 + $0x8] sm:$0xff] %v566_v38 }
 0x1e3 PF: > { %s15_s18 = sadd.s32 1, %s687_s18  }
 0x1e4   : > { %p12_p4 = scmp.ge.s32.totalorder %s15_s18, 4  }
 0x1e6   :  { %14 = sbr.rel (!%p12_p4) target bundleno = 1 (0x1), region = 72 }

</bundles_post_ra>
